<compile_context>
chip_gen: v5e
topology: v5e:2x2
jax: 0.10.0
libtpu: 0.0.40
codegen_flags: <defaults>
</compile_context>

<pallas_src>
import functools

import jax
import jax.numpy as jnp
from jax.experimental import pallas as pl
from jax.experimental.pallas import tpu as pltpu


def _round_up(x: int, m: int) -> int:
    return ((x + m - 1) // m) * m


def _ce_loss_kernel(pred_ref, target_ref, mask_ref, out_ref, *, n_rows, tile_n):
    """One (tile_n, C) tile -> lane-dense (8, 128) partial (num, den) block."""
    x = pred_ref[...]                                    # (tile_n, C) native dtype
    tgt = target_ref[...]                                # (tile_n, 1) int32
    m = mask_ref[...]                                    # (tile_n, 1) f32

    # Row-validity mask: the last tile may read out-of-bounds rows (undefined
    # data); zero their mask and never let their (possibly NaN) loss reach
    # the reduction (jnp.where selects, so garbage never propagates).
    row_ids = (pl.program_id(0) * tile_n
               + jax.lax.broadcasted_iota(jnp.int32, (tile_n, 1), 0))
    row_valid = row_ids < n_rows
    m = jnp.where(row_valid, m, 0.0)

    # Numerically stable logsumexp. max + subtract run in the HBM dtype
    # (bf16 VPU packs 2x/vreg on v6e/v7x); the f32 cast is fused into the
    # exp argument so no full f32 copy of the tile is materialized.
    row_max = jnp.max(x, axis=-1, keepdims=True)                       # (tile_n, 1)
    ex = jnp.exp((x - row_max).astype(jnp.float32))                    # (tile_n, C) f32
    lse = (jnp.log(jnp.sum(ex, axis=-1, keepdims=True))
           + row_max.astype(jnp.float32))                              # (tile_n, 1)

    # Gather pred[i, target[i]] via compare+select on the raw dtype, using a
    # (1, C) lane iota that broadcasts against the (tile_n, 1) targets.
    # One nonzero per row -> the sum is exact in any dtype.
    col_ids = jax.lax.broadcasted_iota(jnp.int32, (1, x.shape[-1]), 1)
    picked = jnp.sum(jnp.where(col_ids == tgt, x, 0),
                     axis=-1, keepdims=True).astype(jnp.float32)       # (tile_n, 1)

    loss = lse - picked                                                # (tile_n, 1)
    num = jnp.sum(jnp.where(row_valid, loss * m, 0.0))                 # scalar
    den = jnp.sum(m)                                                   # scalar

    # Lane-dense (8, 128) partial block: num at [0,0], den at [0,1], zeros
    # elsewhere. Built from small (1,128)/(8,1) iotas (no full-block iotas).
    lane = jax.lax.broadcasted_iota(jnp.int32, (1, 128), 1)
    sub = jax.lax.broadcasted_iota(jnp.int32, (8, 1), 0)
    row0 = jnp.where(lane == 0, num, jnp.where(lane == 1, den, 0.0))   # (1, 128)
    out_ref[...] = jnp.where(sub == 0, row0, 0.0)                      # (8, 128)


def ce_loss(pred, target, mask, *, max_tile_rows=4096):
    """pred: (N, C) float, target: (N,) int, mask: (N,) float -> scalar f32."""
    n, c = pred.shape
    c_lanes = max(c, 128)  # VMEM sizing only (lanes round up to 128 in vregs)

    # Size tile rows so the in-kernel f32 exp temp is ~4 MiB. Budget per step:
    # 2x double-buffered native-dtype pred blocks (<= 4 MiB total for bf16)
    # + 2-3 f32 (tile_n, C) temps (~8-12 MiB) -> well under the 32 MiB scoped
    # VMEM limit, with headroom on v7x (64 MiB physical per TensorCore).
    rows_by_vmem = max(8, ((4 << 20) // (c_lanes * 4)) // 8 * 8)
    tile_n = max(8, min(max_tile_rows, rows_by_vmem, _round_up(n, 8)))
    num_tiles = pl.cdiv(n, tile_n)

    # Only the tiny target/mask arrays get touched host-side (reshape + cast);
    # the logits go to the kernel untouched in their HBM dtype.
    target2 = target.astype(jnp.int32).reshape(n, 1)
    mask2 = mask.astype(jnp.float32).reshape(n, 1)

    kernel = functools.partial(_ce_loss_kernel, n_rows=n, tile_n=tile_n)

    bytes_accessed = (pred.size * pred.dtype.itemsize
                      + n * 4 * 2
                      + num_tiles * 8 * 128 * 4)
    cost = pl.CostEstimate(
        flops=5 * n * c,
        transcendentals=n * c,
        bytes_accessed=bytes_accessed,
    )

    partials = pl.pallas_call(
        kernel,
        out_shape=jax.ShapeDtypeStruct((num_tiles * 8, 128), jnp.float32),
        grid=(num_tiles,),
        in_specs=[
            pl.BlockSpec((tile_n, c), lambda i: (i, 0)),   # full class extent
            pl.BlockSpec((tile_n, 1), lambda i: (i, 0)),
            pl.BlockSpec((tile_n, 1), lambda i: (i, 0)),
        ],
        out_specs=pl.BlockSpec((8, 128), lambda i: (i, 0)),
        compiler_params=pltpu.CompilerParams(
            dimension_semantics=("parallel",),     # keep both v7x TCs streaming
            vmem_limit_bytes=32 * 1024 * 1024,
        ),
        cost_estimate=cost,
    )(pred, target2, mask2)

    # Tiny epilogue reduction in JAX (rows other than each tile's sublane 0
    # are exact zeros, so summing everything is correct).
    num = jnp.sum(partials[:, 0])
    den = jnp.sum(partials[:, 1])
    # Division by zero when mask.sum() == 0 is intentionally unguarded
    # (matches the PyTorch module's behavior).
    return num / den


def _ce_loss_ref(pred, target, mask):
    logp = jax.nn.log_softmax(pred.astype(jnp.float32), axis=-1)
    loss = -jnp.take_along_axis(logp, target[:, None].astype(jnp.int32),
                                axis=-1)[:, 0]
    return jnp.sum(loss * mask.astype(jnp.float32)) / jnp.sum(mask.astype(jnp.float32))


if __name__ == "__main__":
    key = jax.random.PRNGKey(0)
    k1, k2, k3 = jax.random.split(key, 3)

    # Case 1: small aligned shapes, f32 logits (exact path).
    N, C = 8, 32
    pred = jax.random.normal(k1, (N, C), dtype=jnp.float32)
    target = jax.random.randint(k2, (N,), 0, C, dtype=jnp.int32)
    mask = (jax.random.uniform(k3, (N,)) > 0.3).astype(jnp.float32)
    mask = mask.at[0].set(1.0)  # ensure mask.sum() > 0
    out = ce_loss(pred, target, mask)
    jax.block_until_ready(out)
    ref = _ce_loss_ref(pred, target, mask)
    assert jnp.allclose(out, ref, rtol=1e-5, atol=1e-5), (out, ref)

    # Case 2: unaligned shapes (row remainder + non-128 class count), bf16
    # logits streamed in their HBM dtype (bf16 max/sub/gather -> relaxed tol).
    N2, C2 = 13, 50
    k4, k5, k6 = jax.random.split(k1, 3)
    pred2 = jax.random.normal(k4, (N2, C2), dtype=jnp.float32).astype(jnp.bfloat16)
    target2 = jax.random.randint(k5, (N2,), 0, C2, dtype=jnp.int32)
    mask2 = (jax.random.uniform(k6, (N2,)) > 0.5).astype(jnp.float32)
    mask2 = mask2.at[0].set(1.0)
    out2 = ce_loss(pred2, target2, mask2)
    jax.block_until_ready(out2)
    ref2 = _ce_loss_ref(pred2, target2, mask2)
    assert jnp.allclose(out2, ref2, rtol=1e-2, atol=1e-2), (out2, ref2)

    # Case 3: multi-tile grid (3 tiles x 16 rows, last tile has OOB rows),
    # exercising the parallel per-tile partials + in-kernel row mask.
    N3, C3 = 40, 64
    k7, k8, k9 = jax.random.split(k2, 3)
    pred3 = jax.random.normal(k7, (N3, C3), dtype=jnp.float32)
    target3 = jax.random.randint(k8, (N3,), 0, C3, dtype=jnp.int32)
    mask3 = (jax.random.uniform(k9, (N3,)) > 0.3).astype(jnp.float32)
    mask3 = mask3.at[0].set(1.0)
    out3 = ce_loss(pred3, target3, mask3, max_tile_rows=16)
    jax.block_until_ready(out3)
    ref3 = _ce_loss_ref(pred3, target3, mask3)
    assert jnp.allclose(out3, ref3, rtol=1e-5, atol=1e-5), (out3, ref3)

    print("KERNEL_OK")
</pallas_src>

<mosaic_0001>
module attributes {stable_mosaic.version = 11 : i64} {
  func.func @_ce_loss_kernel(%arg0: i32, %arg1: memref<8x32xf32, #tpu.memory_space<vmem>>, %arg2: memref<8x1xi32, #tpu.memory_space<vmem>>, %arg3: memref<8x1xf32, #tpu.memory_space<vmem>>, %arg4: memref<8x128xf32, #tpu.memory_space<vmem>>) attributes {dimension_semantics = [#tpu.dimension_semantics<parallel>], iteration_bounds = array<i64: 1>, scalar_prefetch = 0 : i64, scratch_operands = 0 : i64, tpu.core_type = #tpu.core_type<tc>, window_params = [{transform_indices = @transform_0, window_bounds = array<i64: 8, 32>}, {transform_indices = @transform_1, window_bounds = array<i64: 8, 1>}, {transform_indices = @transform_2, window_bounds = array<i64: 8, 1>}, {transform_indices = @transform_3, window_bounds = array<i64: 8, 128>}]} {
    %c0 = arith.constant 0 : index
    %c0_0 = arith.constant 0 : index
    %0 = vector.load %arg1[%c0, %c0_0] : memref<8x32xf32, #tpu.memory_space<vmem>>, vector<8x32xf32>
    %c0_1 = arith.constant 0 : index
    %c0_2 = arith.constant 0 : index
    %1 = vector.load %arg2[%c0_1, %c0_2] : memref<8x1xi32, #tpu.memory_space<vmem>>, vector<8x1xi32>
    %c0_3 = arith.constant 0 : index
    %c0_4 = arith.constant 0 : index
    %2 = vector.load %arg3[%c0_3, %c0_4] : memref<8x1xf32, #tpu.memory_space<vmem>>, vector<8x1xf32>
    %c8_i32 = arith.constant 8 : i32
    %3 = arith.muli %arg0, %c8_i32 : i32
    %4 = tpu.iota {dimensions = array<i32: 0>} : vector<8x1xi32>
    %5 = vector.broadcast %3 : i32 to vector<8x1xi32>
    %6 = arith.addi %5, %4 : vector<8x1xi32>
    %c8_i32_5 = arith.constant 8 : i32
    %7 = vector.broadcast %c8_i32_5 : i32 to vector<8x1xi32>
    %8 = arith.cmpi slt, %6, %7 : vector<8x1xi32>
    %cst = arith.constant 0.000000e+00 : f32
    %9 = vector.broadcast %cst : f32 to vector<8x1xf32>
    %10 = arith.select %8, %2, %9 : vector<8x1xi1>, vector<8x1xf32>
    %cst_6 = arith.constant dense<0xFF800000> : vector<8xf32>
    %11 = vector.multi_reduction <maximumf>, %0, %cst_6 [1] : vector<8x32xf32> to vector<8xf32>
    %12 = vector.shape_cast %11 : vector<8xf32> to vector<8x1xf32>
    %13 = vector.broadcast %12 : vector<8x1xf32> to vector<8x32xf32>
    %14 = arith.subf %0, %13 : vector<8x32xf32>
    %15 = math.exp %14 : vector<8x32xf32>
    %cst_7 = arith.constant dense<0.000000e+00> : vector<8xf32>
    %16 = vector.multi_reduction <add>, %15, %cst_7 [1] : vector<8x32xf32> to vector<8xf32>
    %17 = vector.shape_cast %16 : vector<8xf32> to vector<8x1xf32>
    %18 = math.log %17 : vector<8x1xf32>
    %19 = arith.addf %18, %12 : vector<8x1xf32>
    %20 = tpu.iota {dimensions = array<i32: 1>} : vector<1x32xi32>
    %21 = vector.broadcast %20 : vector<1x32xi32> to vector<8x32xi32>
    %22 = vector.broadcast %1 : vector<8x1xi32> to vector<8x32xi32>
    %23 = arith.cmpi eq, %21, %22 : vector<8x32xi32>
    %c0_i32 = arith.constant 0 : i32
    %24 = arith.sitofp %c0_i32 : i32 to f32
    %25 = vector.broadcast %24 : f32 to vector<8x32xf32>
    %26 = arith.select %23, %0, %25 : vector<8x32xi1>, vector<8x32xf32>
    %cst_8 = arith.constant dense<0.000000e+00> : vector<8xf32>
    %27 = vector.multi_reduction <add>, %26, %cst_8 [1] : vector<8x32xf32> to vector<8xf32>
    %28 = vector.shape_cast %27 : vector<8xf32> to vector<8x1xf32>
    %29 = arith.subf %19, %28 : vector<8x1xf32>
    %30 = arith.mulf %29, %10 : vector<8x1xf32>
    %cst_9 = arith.constant 0.000000e+00 : f32
    %31 = vector.broadcast %cst_9 : f32 to vector<8x1xf32>
    %32 = arith.select %8, %30, %31 : vector<8x1xi1>, vector<8x1xf32>
    %33 = vector.shape_cast %32 : vector<8x1xf32> to vector<1x8x1xf32>
    %cst_10 = arith.constant dense<0.000000e+00> : vector<1xf32>
    %34 = vector.multi_reduction <add>, %33, %cst_10 [1, 2] : vector<1x8x1xf32> to vector<1xf32>
    %35 = vector.shape_cast %34 : vector<1xf32> to vector<1x1x1xf32>
    %36 = vector.extract %35[0, 0, 0] : f32 from vector<1x1x1xf32>
    %37 = vector.shape_cast %10 : vector<8x1xf32> to vector<1x8x1xf32>
    %cst_11 = arith.constant dense<0.000000e+00> : vector<1xf32>
    %38 = vector.multi_reduction <add>, %37, %cst_11 [1, 2] : vector<1x8x1xf32> to vector<1xf32>
    %39 = vector.shape_cast %38 : vector<1xf32> to vector<1x1x1xf32>
    %40 = vector.extract %39[0, 0, 0] : f32 from vector<1x1x1xf32>
    %41 = tpu.iota {dimensions = array<i32: 1>} : vector<1x128xi32>
    %42 = tpu.iota {dimensions = array<i32: 0>} : vector<8x1xi32>
    %c0_i32_12 = arith.constant 0 : i32
    %43 = vector.broadcast %c0_i32_12 : i32 to vector<1x128xi32>
    %44 = arith.cmpi eq, %41, %43 : vector<1x128xi32>
    %c1_i32 = arith.constant 1 : i32
    %45 = vector.broadcast %c1_i32 : i32 to vector<1x128xi32>
    %46 = arith.cmpi eq, %41, %45 : vector<1x128xi32>
    %cst_13 = arith.constant 0.000000e+00 : f32
    %47 = vector.broadcast %40 : f32 to vector<1x128xf32>
    %48 = vector.broadcast %cst_13 : f32 to vector<1x128xf32>
    %49 = arith.select %46, %47, %48 : vector<1x128xi1>, vector<1x128xf32>
    %50 = vector.broadcast %36 : f32 to vector<1x128xf32>
    %51 = arith.select %44, %50, %49 : vector<1x128xi1>, vector<1x128xf32>
    %c0_i32_14 = arith.constant 0 : i32
    %52 = vector.broadcast %c0_i32_14 : i32 to vector<8x1xi32>
    %53 = arith.cmpi eq, %42, %52 : vector<8x1xi32>
    %cst_15 = arith.constant 0.000000e+00 : f32
    %54 = vector.shape_cast %53 : vector<8x1xi1> to vector<8x1xi1>
    %55 = vector.broadcast %54 : vector<8x1xi1> to vector<8x128xi1>
    %56 = vector.shape_cast %51 : vector<1x128xf32> to vector<1x128xf32>
    %57 = vector.broadcast %56 : vector<1x128xf32> to vector<8x128xf32>
    %58 = vector.broadcast %cst_15 : f32 to vector<8x128xf32>
    %59 = arith.select %55, %57, %58 : vector<8x128xi1>, vector<8x128xf32>
    %c0_16 = arith.constant 0 : index
    %c0_17 = arith.constant 0 : index
    %60 = vector.load %arg4[%c0_16, %c0_17] : memref<8x128xf32, #tpu.memory_space<vmem>>, vector<8x128xf32>
    tpu.vector_store %arg4[%c0_16, %c0_17], %59 {strides = array<i32>} : memref<8x128xf32, #tpu.memory_space<vmem>>, vector<8x128xf32>,
    return
  }
  func.func @transform_0(%arg0: i32) -> (i32, i32) {
    %c0_i32 = arith.constant 0 : i32
    %c0_i32_0 = arith.constant 0 : i32
    return %arg0, %c0_i32 : i32, i32
  }
  func.func @transform_1(%arg0: i32) -> (i32, i32) {
    %c0_i32 = arith.constant 0 : i32
    %c0_i32_0 = arith.constant 0 : i32
    return %arg0, %c0_i32 : i32, i32
  }
  func.func @transform_2(%arg0: i32) -> (i32, i32) {
    %c0_i32 = arith.constant 0 : i32
    %c0_i32_0 = arith.constant 0 : i32
    return %arg0, %c0_i32 : i32, i32
  }
  func.func @transform_3(%arg0: i32) -> (i32, i32) {
    %c0_i32 = arith.constant 0 : i32
    %c0_i32_0 = arith.constant 0 : i32
    return %arg0, %c0_i32 : i32, i32
  }
}

</mosaic_0001>

<bundles_post_ra>
// kernel: tpu_custom_call.1
= control target key start
LH: loop header
LB: loop body
LE: loop exit
PB: predicated region body
PF: predicated region fallthrough
CT: control target
= control target key end

     0   :  { %vm25_vm0 = vcmask 261120   ;;  %s173_s0 = inlined_call_operand.vmem [shape: f32[8,32], index: 0, kind: input, shape index: {}]   ;;  %s174_s1 = inlined_call_operand.vmem [shape: s32[8,1], index: 1, kind: input, shape index: {}]   ;;  %s175_s2 = inlined_call_operand.vmem [shape: f32[8,1], index: 2, kind: input, shape index: {}]   ;;  %s176_s3 = inlined_call_operand.hbm [shape: f32[8,128], index: 3, kind: output, shape index: {}]  }
   0x1   :  { %v15_v0 = vld [vmem:[%s173_s0] sm:$0xff] }
   0x2   :  { %8 = vsyncpa [#allocation3], 0  ;;  %v26_v1 = vsel %vm25_vm0, %v15_v0, -inf  ;;  %v136_v2 = vmov 0   ;;  %v16_v3 = vld [vmem:[%s174_s1] sm:$0xff]  ;;  %v19_v9 = vlaneseq  ;;  %vm51_vm2 = vcmask 7168  }
   0x3   :  { %105 = vset.pattern.permute.xlu0 %v136_v2  ;;  %v17_v19 = vld [vmem:[%s175_s2] sm:$0xff]  ;;  %s137_s16 = smov [#allocation2]   ;;  %s90_s21 = sshll.u32 %s176_s3, 4  ;;  %s91_s21 = int_to_ptr.hbm [resolvable:$true] %s90_s21 }
   0x4   :  { %27 = vmax.xlane.f32.xlu0 %v26_v1  ;;  %v39_v10 = vand.u32 127, %v19_v9  ;;  %v62_v23 = vsel %vm51_vm2, %v17_v19, 0.0  ;;  %v20_v38 = vshrl.u32 %v19_v9, 7  ;;  %s88_s17 = sshll.u32 %s137_s16, 4  ;;  %s89_s17 = int_to_ptr.vmem [resolvable:$true] %s88_s17 }
   0x6   :  { %vm73_vm3 = vcmp.eq.s32.totalorder %v39_v10, 1  ;;  %vm72_vm4 = vcmp.eq.s32.totalorder %v39_v10, 0  ;;  %vm78_vm5 = vcmp.eq.s32.totalorder %v20_v38, 0 }
  0x18   :  { %41 = vperm.xlu0 %105, %v16_v3  }
  0x77   :  { %v28_v4 = vpop.xlane.xlu0 %27 }
  0x78   :  { %v29_v5 = vsub.f32 %v15_v0, %v28_v4 }
  0x7a   :  { %v30_v6 = vmul.f32 1.442695, %v29_v5 }
  0x7c   :  { %106 = vpow2.f32 %v30_v6 }
  0x82   :  { %v107_v7 = vpop.eup %106 }
  0x83   :  { %v32_v8 = vsel %vm25_vm0, %v107_v7, 0.0 }
  0x84   :  { %33 = vadd.xlane.f32.xlu1 %v32_v8 }
  0x8a   :  { %v42_v11 = vpop.permute.xlu0 %41 }
  0x8b   :  { %vm43_vm1 = vcmp.eq.s32.totalorder %v39_v10, %v42_v11 }
  0x8c   :  { %v44_v12 = vsel %vm43_vm1, %v15_v0, 0.0 }
  0x8d   :  { %v45_v13 = vsel %vm25_vm0, %v44_v12, 0.0 }
  0x8e   :  { %46 = vadd.xlane.f32.xlu1 %v45_v13 }
  0xf7   :  { %v34_v14 = vpop.xlane.xlu1 %33 }
  0xf8   :  { %108 = vlog2.f32 %v34_v14 }
  0xfe   :  { %v109_v15 = vpop.eup %108 }
  0xff   :  { %v36_v16 = vmul.f32 0.6931472, %v109_v15 }
 0x101   :  { %v37_v17 = vadd.f32 %v36_v16, %v28_v4  ;;  %v47_v18 = vpop.xlane.xlu1 %46 }
 0x103   :  { %v48_v20 = vsub.f32 %v37_v17, %v47_v18 }
 0x105   :  { %v49_v21 = vmul.f32 %v48_v20, %v17_v19 }
 0x107   :  { %v52_v22 = vsel %vm51_vm2, %v49_v21, 0.0 }
 0x108   :  { %53 = vadd.xlane.f32.xlu2 %v52_v22 }
 0x110   :  { %63 = vadd.xlane.f32.xlu2 %v62_v23 }
 0x17b   :  { %v54_v24 = vpop.xlane.xlu2 %53 }
 0x17c   :  { %v55_v25 = vrot.slane %v54_v24, 4 }
 0x17e   :  { %v56_v26 = vadd.f32 %v55_v25, %v54_v24 }
 0x180   :  { %v57_v27 = vrot.slane %v56_v26, 2 }
 0x182   :  { %v58_v28 = vadd.f32 %v57_v27, %v56_v26 }
 0x183   :  { %v64_v29 = vpop.xlane.xlu2 %63 }
 0x184   :  { %v65_v30 = vrot.slane %v64_v29, 4  ;;  %v59_v31 = vrot.slane %v58_v28, 1 }
 0x186   :  { %v66_v32 = vadd.f32 %v65_v30, %v64_v29  ;;  %v60_v33 = vadd.f32 %v59_v31, %v58_v28 }
 0x188   :  { %v67_v34 = vrot.slane %v66_v32, 2  ;;  %99 = vpush %v60_v33 }
 0x18a   :  { %v68_v35 = vadd.f32 %v67_v34, %v66_v32 }
 0x18c   :  { %v69_v36 = vrot.slane %v68_v35, 1 }
 0x18e   :  { %v70_v37 = vadd.f32 %v69_v36, %v68_v35 }
 0x190   :  { %101 = vpush %v70_v37 }
 0x1b9   :  { %s100_s2 = spop %99 }
 0x1ba   :  { %v76_v40 = vstv %s100_s2 }
 0x1c1   :  { %s102_s18 = spop %101 }
 0x1c2   :  { %v74_v39 = vstv %s102_s18 }
 0x1c3   :  { %v75_v41 = vsel %vm73_vm3, %v74_v39, 0.0 }
 0x1c4   :  { %v77_v42 = vsel %vm72_vm4, %v76_v40, %v75_v41 }
 0x1c5   :  { %v81_v43 = vsel %vm78_vm5, %v77_v42, 0.0 }
 0x1c6   :  { %82 = vst [vmem:[#allocation2] sm:$0xff] %v81_v43 }
 0x1c7   :  { %93 = dma.vmem_to_hbm [thread:$0]  %s89_s17, 128, %s91_s21, [#allocation3]  }
 0x1c8   :  { %134 = dma.done.wait [#allocation3], 128  }
 0x1c9   :  { %135 = vsyncadd [#allocation3], 4294967168 }
 0x1ca   :  { %98 = vsyncpa [#allocation3], 1 }

</bundles_post_ra>
